<compile_context>
chip_gen: v7x
topology: tpu7x:2x2x1
jax: 0.10.0
libtpu: 0.0.40
codegen_flags: <defaults>
</compile_context>

<pallas_src>
import functools

import jax
import jax.numpy as jnp
from jax.experimental import pallas as pl
from jax.experimental.pallas import tpu as pltpu


def bert_classifier_kernel(vlen_ref,        # VMEM (TB, 1)      int32
                           emb_ref,         # VMEM (TB, TS, H)  bf16  (streamed)
                           wp_ref, bp_ref,  # VMEM (H, H) bf16, (1, H) f32
                           wc_ref, bc_ref,  # VMEM (H, C_PAD) bf16, (1, C_PAD) f32
                           out_ref,         # VMEM (TB, C_PAD)  f32
                           acc_ref):        # VMEM scratch (TB, H) f32
    j = pl.program_id(1)                    # sequence tile ("arbitrary" / reduction)
    nj = pl.num_programs(1)
    TB, TS, H = emb_ref.shape
    S_total = nj * TS

    @pl.when(j == 0)
    def _init():
        acc_ref[...] = jnp.zeros_like(acc_ref)

    # --- gen_attention_mask for this sequence tile ---------------------------
    # mask[b, s] = 1 iff (j*TS + s) < valid_length[b]; lengths come in as a
    # (TB, 1) VMEM block, so there is no per-row scalar plumbing in the loop.
    vlen = vlen_ref[...]                                            # (TB, 1) int32
    pos = j * TS + jax.lax.broadcasted_iota(jnp.int32, (TB, TS), 1)
    mask = (pos < vlen).astype(emb_ref.dtype)                       # (TB, TS) bf16

    # --- masked sum over the sequence tile -----------------------------------
    # bf16 elementwise multiply (VPU) + f32 sequence reduction: the HBM/VMEM
    # stream stays bf16; only the accumulate path is widened to f32.
    masked = emb_ref[...] * mask[:, :, None]                        # (TB, TS, H) bf16
    acc_ref[...] += jnp.sum(masked.astype(jnp.float32), axis=1)     # (TB, H) f32

    # --- finalize on the last sequence tile -----------------------------------
    @pl.when(j == nj - 1)
    def _finalize():
        denom = jnp.clip(vlen, 1, S_total).astype(jnp.float32)      # (TB, 1)
        # EUP reciprocal instead of a VPU divide.
        pooled = acc_ref[...] * pl.reciprocal(denom, approx=True)   # (TB, H) f32

        # BERT pooler: tanh(Linear) — bf16 MXU path, f32 accumulate.
        pooler = jnp.tanh(
            jnp.dot(pooled.astype(wp_ref.dtype), wp_ref[...],
                    preferred_element_type=jnp.float32) + bp_ref[...])

        # dropout (dr_rate=None -> identity / eval mode)

        # classifier Linear (lane-padded to C_PAD=128 -> lane-dense store).
        out_ref[...] = (
            jnp.dot(pooler.astype(wc_ref.dtype), wc_ref[...],
                    preferred_element_type=jnp.float32) + bc_ref[...])


def bert_classifier_forward(token_ids, valid_length, segment_ids, params,
                            *, tile_b=8, tile_s=512):
    tok_emb = params["tok_emb"]          # (V, H) bf16
    seg_emb = params["seg_emb"]          # (2, H) bf16
    pos_emb = params["pos_emb"]          # (S, H) bf16
    wp, bp = params["wp"], params["bp"]  # (H, H) bf16, (1, H) f32
    wc, bc = params["wc"], params["bc"]  # (H, C) bf16, (1, C) f32

    # TODO(synk): the full pretrained multi-layer KoBERT transformer encoder
    #             (external checkpoint submodule) is not reproduced; a
    #             deterministic masked-mean pooler path stands in for it.
    # TODO(synk): the embedding gather stays as XLA glue; fully fusing it would
    #             need a per-row DMA gather from a pl.ANY embedding table to
    #             remove the (B, S, H) HBM round-trip.
    emb = (jnp.take(tok_emb, token_ids, axis=0).astype(jnp.float32)
           + jnp.take(seg_emb, segment_ids, axis=0).astype(jnp.float32)
           + pos_emb[None, :, :].astype(jnp.float32)).astype(jnp.bfloat16)

    B, S, H = emb.shape
    C = wc.shape[1]
    C_PAD = max(128, ((C + 127) // 128) * 128)   # lane-dense classifier output
    TB = min(tile_b, B)
    TS = min(tile_s, S)
    assert B % TB == 0 and S % TS == 0, "toy wrapper assumes divisible tiles"
    assert TB % 8 == 0 or TB == B, "batch tile must be sublane-aligned"
    assert TS >= 16, "bf16 sequence tile must be >= 16 (sublane packing)"

    wc_pad = jnp.zeros((H, C_PAD), wc.dtype).at[:, :C].set(wc)
    bc_pad = jnp.zeros((1, C_PAD), jnp.float32).at[:, :C].set(bc)
    vlen2d = valid_length.astype(jnp.int32).reshape(B, 1)

    grid = (B // TB, S // TS)
    logits_pad = pl.pallas_call(
        bert_classifier_kernel,
        out_shape=jax.ShapeDtypeStruct((B, C_PAD), jnp.float32),
        grid_spec=pltpu.PrefetchScalarGridSpec(
            num_scalar_prefetch=0,
            grid=grid,
            in_specs=[
                pl.BlockSpec((TB, 1),     lambda i, j: (i, 0)),     # valid_length
                pl.BlockSpec((TB, TS, H), lambda i, j: (i, j, 0)),  # emb (streamed)
                pl.BlockSpec((H, H),      lambda i, j: (0, 0)),     # wp (resident)
                pl.BlockSpec((1, H),      lambda i, j: (0, 0)),     # bp
                pl.BlockSpec((H, C_PAD),  lambda i, j: (0, 0)),     # wc
                pl.BlockSpec((1, C_PAD),  lambda i, j: (0, 0)),     # bc
            ],
            out_specs=pl.BlockSpec((TB, C_PAD), lambda i, j: (i, 0)),
            scratch_shapes=[pltpu.VMEM((TB, H), jnp.float32)],
        ),
        compiler_params=pltpu.CompilerParams(
            dimension_semantics=("parallel", "arbitrary"),
            vmem_limit_bytes=32 * 1024 * 1024),   # footprint + headroom; v7x-safe
    )(vlen2d, emb, wp, bp, wc_pad, bc_pad)

    return logits_pad[:, :C]


def reference_forward(token_ids, valid_length, segment_ids, params):
    """Pure-JAX reference of the same synthetic pooler path (f32 math on the
    same bf16-stored parameters)."""
    emb = (jnp.take(params["tok_emb"], token_ids, axis=0).astype(jnp.float32)
           + jnp.take(params["seg_emb"], segment_ids, axis=0).astype(jnp.float32)
           + params["pos_emb"][None, :, :].astype(jnp.float32)
           ).astype(jnp.bfloat16).astype(jnp.float32)
    B, S, H = emb.shape
    mask = (jnp.arange(S)[None, :] < valid_length[:, None]).astype(jnp.float32)
    summed = jnp.einsum("bs,bsh->bh", mask, emb)
    denom = jnp.clip(valid_length.astype(jnp.float32), 1.0, float(S))[:, None]
    pooled = summed / denom
    pooler = jnp.tanh(pooled @ params["wp"].astype(jnp.float32) + params["bp"])
    return pooler @ params["wc"].astype(jnp.float32) + params["bc"]


def make_params(key, vocab=64, seq=64, hidden=128, num_classes=2):
    ks = jax.random.split(key, 7)
    scale = 0.05
    f32, bf16 = jnp.float32, jnp.bfloat16
    return {
        "tok_emb": (scale * jax.random.normal(ks[0], (vocab, hidden), f32)).astype(bf16),
        "seg_emb": (scale * jax.random.normal(ks[1], (2, hidden), f32)).astype(bf16),
        "pos_emb": (scale * jax.random.normal(ks[2], (seq, hidden), f32)).astype(bf16),
        "wp": (scale * jax.random.normal(ks[3], (hidden, hidden), f32)).astype(bf16),
        "bp": 0.01 * jax.random.normal(ks[4], (1, hidden), f32),
        "wc": (scale * jax.random.normal(ks[5], (hidden, num_classes), f32)).astype(bf16),
        "bc": 0.01 * jax.random.normal(ks[6], (1, num_classes), f32),
    }


if __name__ == "__main__":
    B, S, H, V, C = 16, 64, 128, 64, 2
    key = jax.random.PRNGKey(0)
    k_tok, k_len, k_par = jax.random.split(key, 3)

    token_ids = jax.random.randint(k_tok, (B, S), 0, V, dtype=jnp.int32)
    segment_ids = jnp.zeros((B, S), jnp.int32)
    valid_length = jax.random.randint(k_len, (B,), 1, S + 1, dtype=jnp.int32)
    valid_length = valid_length.at[0].set(S).at[1].set(1)   # edge cases

    params = make_params(k_par, vocab=V, seq=S, hidden=H, num_classes=C)
    ref = reference_forward(token_ids, valid_length, segment_ids, params)

    # Default tiles: TS = full sequence -> grid (2, 1); 2 parallel batch
    # blocks so a v7x megacore can split the batch axis.
    logits = jax.jit(bert_classifier_forward)(
        token_ids, valid_length, segment_ids, params)
    jax.block_until_ready(logits)
    assert logits.shape == (B, C) and logits.dtype == jnp.float32
    err = float(jnp.max(jnp.abs(logits - ref)))
    assert err < 1e-2, f"kernel/reference mismatch (full-seq tile): {err}"

    # Smaller sequence tile -> grid (2, 2): exercises the multi-step
    # sequence-reduction / accumulator path as well.
    logits2 = jax.jit(functools.partial(bert_classifier_forward, tile_s=32))(
        token_ids, valid_length, segment_ids, params)
    jax.block_until_ready(logits2)
    err2 = float(jnp.max(jnp.abs(logits2 - ref)))
    assert err2 < 1e-2, f"kernel/reference mismatch (multi-tile): {err2}"

    print("KERNEL_OK")
</pallas_src>

<mosaic_0001>
module attributes {stable_mosaic.version = 11 : i64} {
  func.func @bert_classifier_kernel(%arg0: i32, %arg1: i32, %arg2: memref<8x1xi32, #tpu.memory_space<vmem>>, %arg3: memref<8x64x128xbf16, #tpu.memory_space<vmem>>, %arg4: memref<128x128xbf16, #tpu.memory_space<vmem>>, %arg5: memref<1x128xf32, #tpu.memory_space<vmem>>, %arg6: memref<128x128xbf16, #tpu.memory_space<vmem>>, %arg7: memref<1x128xf32, #tpu.memory_space<vmem>>, %arg8: memref<8x128xf32, #tpu.memory_space<vmem>>, %arg9: memref<8x128xf32, #tpu.memory_space<vmem>>) attributes {dimension_semantics = [#tpu.dimension_semantics<parallel>, #tpu.dimension_semantics<arbitrary>], iteration_bounds = array<i64: 2, 1>, scalar_prefetch = 0 : i64, scratch_operands = 1 : i64, tpu.core_type = #tpu.core_type<tc>, window_params = [{transform_indices = @transform_0, window_bounds = array<i64: 8, 1>}, {transform_indices = @transform_1, window_bounds = array<i64: 8, 64, 128>}, {pipeline_mode = #tpu.pipeline_mode<synchronous>, transform_indices = @transform_2, window_bounds = array<i64: 128, 128>}, {pipeline_mode = #tpu.pipeline_mode<synchronous>, transform_indices = @transform_3, window_bounds = array<i64: 1, 128>}, {pipeline_mode = #tpu.pipeline_mode<synchronous>, transform_indices = @transform_4, window_bounds = array<i64: 128, 128>}, {pipeline_mode = #tpu.pipeline_mode<synchronous>, transform_indices = @transform_5, window_bounds = array<i64: 1, 128>}, {transform_indices = @transform_6, window_bounds = array<i64: 8, 128>}]} {
    %c0_i32 = arith.constant 0 : i32
    %0 = arith.cmpi eq, %arg1, %c0_i32 : i32
    %1 = arith.extui %0 : i1 to i32
    %c0_i32_0 = arith.constant 0 : i32
    %2 = arith.cmpi ne, %1, %c0_i32_0 : i32
    scf.if %2 {
      %cst_11 = arith.constant 0.000000e+00 : f32
      %25 = vector.broadcast %cst_11 : f32 to vector<8x128xf32>
      %c0_12 = arith.constant 0 : index
      %c0_13 = arith.constant 0 : index
      %26 = vector.load %arg9[%c0_12, %c0_13] : memref<8x128xf32, #tpu.memory_space<vmem>>, vector<8x128xf32>
      tpu.vector_store %arg9[%c0_12, %c0_13], %25 {strides = array<i32>} : memref<8x128xf32, #tpu.memory_space<vmem>>, vector<8x128xf32>,
    } else {
    }
    %c0 = arith.constant 0 : index
    %c0_1 = arith.constant 0 : index
    %3 = vector.load %arg2[%c0, %c0_1] : memref<8x1xi32, #tpu.memory_space<vmem>>, vector<8x1xi32>
    %c64_i32 = arith.constant 64 : i32
    %4 = arith.muli %arg1, %c64_i32 : i32
    %5 = tpu.iota {dimensions = array<i32: 1>} : vector<8x64xi32>
    %6 = vector.broadcast %4 : i32 to vector<8x64xi32>
    %7 = arith.addi %6, %5 : vector<8x64xi32>
    %8 = vector.broadcast %3 : vector<8x1xi32> to vector<8x64xi32>
    %9 = arith.cmpi slt, %7, %8 : vector<8x64xi32>
    %10 = arith.extui %9 : vector<8x64xi1> to vector<8x64xi32>
    %11 = arith.sitofp %10 : vector<8x64xi32> to vector<8x64xf32>
    %12 = arith.truncf %11 : vector<8x64xf32> to vector<8x64xbf16>
    %c0_2 = arith.constant 0 : index
    %c0_3 = arith.constant 0 : index
    %c0_4 = arith.constant 0 : index
    %13 = vector.load %arg3[%c0_2, %c0_3, %c0_4] : memref<8x64x128xbf16, #tpu.memory_space<vmem>>, vector<8x64x128xbf16>
    %14 = vector.shape_cast %12 : vector<8x64xbf16> to vector<8x64x1xbf16>
    %15 = vector.broadcast %14 : vector<8x64x1xbf16> to vector<8x64x128xbf16>
    %16 = arith.mulf %13, %15 : vector<8x64x128xbf16>
    %c0_5 = arith.constant 0 : index
    %c0_6 = arith.constant 0 : index
    %17 = vector.load %arg9[%c0_5, %c0_6] : memref<8x128xf32, #tpu.memory_space<vmem>>, vector<8x128xf32>
    %18 = arith.extf %16 : vector<8x64x128xbf16> to vector<8x64x128xf32>
    %cst = arith.constant dense<0.000000e+00> : vector<8x128xf32>
    %19 = vector.multi_reduction <add>, %18, %cst [1] : vector<8x64x128xf32> to vector<8x128xf32>
    %20 = arith.addf %17, %19 : vector<8x128xf32>
    %c0_7 = arith.constant 0 : index
    %c0_8 = arith.constant 0 : index
    %21 = vector.load %arg9[%c0_7, %c0_8] : memref<8x128xf32, #tpu.memory_space<vmem>>, vector<8x128xf32>
    tpu.vector_store %arg9[%c0_7, %c0_8], %20 {strides = array<i32>} : memref<8x128xf32, #tpu.memory_space<vmem>>, vector<8x128xf32>,
    %c0_i32_9 = arith.constant 0 : i32
    %22 = arith.cmpi eq, %arg1, %c0_i32_9 : i32
    %23 = arith.extui %22 : i1 to i32
    %c0_i32_10 = arith.constant 0 : i32
    %24 = arith.cmpi ne, %23, %c0_i32_10 : i32
    scf.if %24 {
      %c1_i32 = arith.constant 1 : i32
      %c64_i32_11 = arith.constant 64 : i32
      %25 = vector.broadcast %c1_i32 : i32 to vector<8x1xi32>
      %26 = arith.maxsi %25, %3 : vector<8x1xi32>
      %27 = vector.broadcast %c64_i32_11 : i32 to vector<8x1xi32>
      %28 = arith.minsi %27, %26 : vector<8x1xi32>
      %29 = arith.sitofp %28 : vector<8x1xi32> to vector<8x1xf32>
      %c0_12 = arith.constant 0 : index
      %c0_13 = arith.constant 0 : index
      %30 = vector.load %arg9[%c0_12, %c0_13] : memref<8x128xf32, #tpu.memory_space<vmem>>, vector<8x128xf32>
      %31 = tpu.reciprocal %29 {approx = true} : vector<8x1xf32> -> vector<8x1xf32>
      %32 = vector.broadcast %31 : vector<8x1xf32> to vector<8x128xf32>
      %33 = arith.mulf %30, %32 : vector<8x128xf32>
      %34 = arith.truncf %33 : vector<8x128xf32> to vector<8x128xbf16>
      %c0_14 = arith.constant 0 : index
      %c0_15 = arith.constant 0 : index
      %35 = vector.load %arg4[%c0_14, %c0_15] : memref<128x128xbf16, #tpu.memory_space<vmem>>, vector<128x128xbf16>
      %cst_16 = arith.constant dense<0.000000e+00> : vector<8x128xf32>
      %36 = tpu.matmul %34, %35, %cst_16 {dimension_numbers = #tpu.dot_dimension_numbers<[1], [0], [0], [1], [0, 0, 1, 1], [], []>} : vector<8x128xbf16>, vector<128x128xbf16>, vector<8x128xf32> -> vector<8x128xf32>
      %c0_17 = arith.constant 0 : index
      %c0_18 = arith.constant 0 : index
      %37 = vector.load %arg5[%c0_17, %c0_18] : memref<1x128xf32, #tpu.memory_space<vmem>>, vector<1x128xf32>
      %38 = vector.broadcast %37 : vector<1x128xf32> to vector<8x128xf32>
      %39 = arith.addf %36, %38 : vector<8x128xf32>
      %40 = math.tanh %39 : vector<8x128xf32>
      %41 = arith.truncf %40 : vector<8x128xf32> to vector<8x128xbf16>
      %c0_19 = arith.constant 0 : index
      %c0_20 = arith.constant 0 : index
      %42 = vector.load %arg6[%c0_19, %c0_20] : memref<128x128xbf16, #tpu.memory_space<vmem>>, vector<128x128xbf16>
      %cst_21 = arith.constant dense<0.000000e+00> : vector<8x128xf32>
      %43 = tpu.matmul %41, %42, %cst_21 {dimension_numbers = #tpu.dot_dimension_numbers<[1], [0], [0], [1], [0, 0, 1, 1], [], []>} : vector<8x128xbf16>, vector<128x128xbf16>, vector<8x128xf32> -> vector<8x128xf32>
      %c0_22 = arith.constant 0 : index
      %c0_23 = arith.constant 0 : index
      %44 = vector.load %arg7[%c0_22, %c0_23] : memref<1x128xf32, #tpu.memory_space<vmem>>, vector<1x128xf32>
      %45 = vector.broadcast %44 : vector<1x128xf32> to vector<8x128xf32>
      %46 = arith.addf %43, %45 : vector<8x128xf32>
      %c0_24 = arith.constant 0 : index
      %c0_25 = arith.constant 0 : index
      %47 = vector.load %arg8[%c0_24, %c0_25] : memref<8x128xf32, #tpu.memory_space<vmem>>, vector<8x128xf32>
      tpu.vector_store %arg8[%c0_24, %c0_25], %46 {strides = array<i32>} : memref<8x128xf32, #tpu.memory_space<vmem>>, vector<8x128xf32>,
    } else {
    }
    return
  }
  func.func @transform_0(%arg0: i32, %arg1: i32) -> (i32, i32) {
    %c0_i32 = arith.constant 0 : i32
    %c0_i32_0 = arith.constant 0 : i32
    return %arg0, %c0_i32 : i32, i32
  }
  func.func @transform_1(%arg0: i32, %arg1: i32) -> (i32, i32, i32) {
    %c0_i32 = arith.constant 0 : i32
    %c0_i32_0 = arith.constant 0 : i32
    return %arg0, %arg1, %c0_i32 : i32, i32, i32
  }
  func.func @transform_2(%arg0: i32, %arg1: i32) -> (i32, i32) {
    %c0_i32 = arith.constant 0 : i32
    %c0_i32_0 = arith.constant 0 : i32
    %c0_i32_1 = arith.constant 0 : i32
    return %c0_i32, %c0_i32_0 : i32, i32
  }
  func.func @transform_3(%arg0: i32, %arg1: i32) -> (i32, i32) {
    %c0_i32 = arith.constant 0 : i32
    %c0_i32_0 = arith.constant 0 : i32
    %c0_i32_1 = arith.constant 0 : i32
    return %c0_i32, %c0_i32_0 : i32, i32
  }
  func.func @transform_4(%arg0: i32, %arg1: i32) -> (i32, i32) {
    %c0_i32 = arith.constant 0 : i32
    %c0_i32_0 = arith.constant 0 : i32
    %c0_i32_1 = arith.constant 0 : i32
    return %c0_i32, %c0_i32_0 : i32, i32
  }
  func.func @transform_5(%arg0: i32, %arg1: i32) -> (i32, i32) {
    %c0_i32 = arith.constant 0 : i32
    %c0_i32_0 = arith.constant 0 : i32
    %c0_i32_1 = arith.constant 0 : i32
    return %c0_i32, %c0_i32_0 : i32, i32
  }
  func.func @transform_6(%arg0: i32, %arg1: i32) -> (i32, i32) {
    %c0_i32 = arith.constant 0 : i32
    %c0_i32_0 = arith.constant 0 : i32
    return %arg0, %c0_i32 : i32, i32
  }
}

</mosaic_0001>

<bundles_post_ra>
// kernel: bert_classifier_forward.1
= control target key start
LH: loop header
LB: loop body
LE: loop exit
PB: predicated region body
PF: predicated region fallthrough
CT: control target
= control target key end

     0   :  { %s1869_s21 = smov 0   ;;  %s1871_s22 = smov 0   ;;  %s2154_s0 = inlined_call_operand.vmem [shape: s32[16,1], index: 0, kind: input, shape index: {}]   ;;  %s2155_s1 = inlined_call_operand.vmem [shape: bf16[16,64,128], index: 1, kind: input, shape index: {}]   ;;  %s2156_s2 = inlined_call_operand.vmem [shape: bf16[128,128], index: 2, kind: input, shape index: {}]   ;;  %s2157_s3 = inlined_call_operand.vmem [shape: f32[1,128], index: 3, kind: input, shape index: {}]   ;;  %s2158_s4 = inlined_call_operand.vmem [shape: bf16[128,128], index: 4, kind: input, shape index: {}]   ;;  %s2159_s5 = inlined_call_operand.vmem [shape: f32[1,128], index: 5, kind: input, shape index: {}]   ;;  %s2160_s6 = inlined_call_operand.vmem [shape: f32[16,128], index: 6, kind: output, shape index: {}]  }
   0x1   :  { %s1873_s23 = smov 0  }
   0x2 LB: > { %s28_s24 = sadd.s32 1, %s1823_s22  ;;  %p1668_p0 = scmp.ge.s32.totalorder %s1827_s23, 1  ;;  %s1827_s23 = sphi %s1873_s23, %s16_s23   ;;  %s1823_s22 = sphi %s1871_s22, %s2162_s22   ;;  %s1819_s21 = sphi %s1869_s21, %s2161_s21  }
   0x3   : > { %p30_p1 = scmp.ge.s32.totalorder %s28_s24, 2  ;;  %p242_p2 = scmp.lt.s32.totalorder %s1827_s23, 3 }
   0x5   : > { %s2164_s24 = smov (%p30_p1, %s28_s24), 0  ;;  %p243_p3 = pnand %p1668_p0, %p242_p2 }
   0x6   : > { %p280_p4 = scmp.lt.s32.totalorder (!%p243_p3), %s1819_s21, 1  ;;  %v1829_v0 = vmov (!%p243_p3), 0   ;;  %v1830_v1 = vmov (!%p243_p3), 0.0   ;;  %v308_v3 = vlaneseq (!%p243_p3)  ;;  %v1785_v27 = vld [vmem:[%s2156_s2] sm:$0xff] (!%p243_p3)   ;;  %v1786_v28 = vld [vmem:[%s2156_s2 + $0x8] sm:$0xff] (!%p243_p3)   ;;  %v1787_v29 = vld [vmem:[%s2156_s2 + $0x10] sm:$0xff] (!%p243_p3)  }
   0x7   : > { %246 = sbr.rel (%p243_p3) target bundleno = 802 (0x322), region = 44  ;;  %1783 = vset.pattern.permute.xlu0 (!%p243_p3), %v1829_v0  ;;  %1784 = vset.pattern.permute.xlu1 (!%p243_p3), %v1829_v0  ;;  %v1788_v31 = vld [vmem:[%s2156_s2 + $0x18] sm:$0xff] (!%p243_p3)   ;;  %v1789_v32 = vld [vmem:[%s2156_s2 + $0x20] sm:$0xff] (!%p243_p3)   ;;  %v1790_v33 = vld [vmem:[%s2156_s2 + $0x28] sm:$0xff] (!%p243_p3)   ;;  %vm1831_vm3 = vmmov (!%p243_p3), 0   ;;  %s1670_s12 = sshll.u32 (!%p243_p3), %s1819_s21, 3 }
   0x8   : > { %1714 = vmatprep.subr.bf16.mxu0 (!%p243_p3), %v1830_v1  ;;  %1734 = vmatprep.subr.bf16.mxu1 (!%p243_p3), %v1830_v1  ;;  %v309_v4 = vand.u32 (!%p243_p3), 127, %v308_v3  ;;  %v1901_v5 = vshrl.u32 (!%p243_p3), %v308_v3, 7  ;;  %v1791_v34 = vld [vmem:[%s2156_s2 + $0x30] sm:$0xff] (!%p243_p3)   ;;  %v1792_v35 = vld [vmem:[%s2156_s2 + $0x38] sm:$0xff] (!%p243_p3)   ;;  %v1793_v36 = vld [vmem:[%s2158_s4] sm:$0xff] (!%p243_p3)   ;;  %p286_p5 = scmp.lt.s32.totalorder (!%p243_p3), %s1670_s12, 15 }
   0x9   : > { %1715 = vmatpush3.bf16.msra.mxu0 (!%p243_p3), %v1785_v27  ;;  %1730 = vmatprep.mubr.msk.bf16.mxu0 (!%p243_p3), %vm1831_vm3, %v1830_v1  ;;  %v1794_v37 = vld [vmem:[%s2158_s4 + $0x8] sm:$0xff] (!%p243_p3)   ;;  %v1795_v38 = vld [vmem:[%s2158_s4 + $0x10] sm:$0xff] (!%p243_p3)   ;;  %v1796_v39 = vld [vmem:[%s2158_s4 + $0x18] sm:$0xff] (!%p243_p3)   ;;  %v1832_v40 = vmov (!%p243_p3), 839922192   ;;  %vm1326_vm4 = vcmask (!%p243_p3), 1041409  }
   0xa   : > { %v429_v9 = vsub.s32 (!%p243_p3), 1, %v1901_v5  ;;  %v388_v10 = vsub.s32 (!%p243_p3), 0, %v1901_v5  ;;  %v467_v14 = vsub.s32 (!%p243_p3), 2, %v1901_v5  ;;  %v505_v16 = vsub.s32 (!%p243_p3), 3, %v1901_v5  ;;  %1716 = vmatprep.subr.bf16.mxu0 (!%p243_p3), %v1830_v1  ;;  %1750 = vmatprep.mubr.msk.bf16.mxu1 (!%p243_p3), %vm1831_vm3, %v1830_v1 }
   0xb   : > { %1735 = vmatpush3.bf16.msra.mxu1 (!%p243_p3), %v1793_v36  ;;  %v574_v41 = vunpack.c.l.s4 (!%p243_p3), %v1832_v40  ;;  %v1833_v42 = vmov (!%p243_p3), 1985246804   ;;  %vm1328_vm5 = vcmask (!%p243_p3), 1042434   ;;  %vm1330_vm6 = vcmask (!%p243_p3), 1043459  }
   0xc   : > { %1736 = vmatprep.subr.bf16.mxu1 (!%p243_p3), %v1830_v1  ;;  %v581_v43 = vunpack.c.l.s4 (!%p243_p3), %v1833_v42  ;;  %vm1332_vm7 = vcmask (!%p243_p3), 1044484   ;;  %vm1334_vm8 = vcmask (!%p243_p3), 1045509   ;;  %vm1336_vm9 = vcmask (!%p243_p3), 1046534  }
   0xd   : > { %1717 = vmatpush3.bf16.msra.mxu0 (!%p243_p3), %v1786_v28  ;;  %v575_v44 = vunpack.c.0.s8 (!%p243_p3), %v574_v41  ;;  %vm1338_vm10 = vcmask (!%p243_p3), 1047559  }
   0xe   : > { %s1891_s25 = scalar_select %p280_p4, %s1819_s21, 1  ;;  %1718 = vmatprep.subr.bf16.mxu0 %v1830_v1  ;;  %v582_v45 = vunpack.c.0.s8 %v581_v43 }
   0xf   : > { %1737 = vmatpush3.bf16.msra.mxu1 %v1794_v37  ;;  %s2166_s12 = smov (!%p286_p5, %s1670_s12), 15  ;;  %v1959_v46 = vsub.s32 %v575_v44, %v1901_v5 }
  0x10   : > { %s1669_s26 = sshll.u32 %s1891_s25, 3  ;;  %1738 = vmatprep.subr.bf16.mxu1 %v1830_v1  ;;  %s1695_s13 = sshll.u32 %s2166_s12, 5  ;;  %v1962_v47 = vsub.s32 %v582_v45, %v1901_v5 }
  0x11   : > { %s283_s29 = scalar_lea.vmem %s2154_s0, %s1669_s26  ;;  %1719 = vmatpush3.bf16.msra.mxu0 %v1787_v29  ;;  %s1967_s16 = scalar_lea.vmem %s2155_s1, %s1695_s13 }
  0x12   : > { %v306_v2 = vld [vmem:[%s283_s29] sm:$0xff]  ;;  %1720 = vmatprep.subr.bf16.mxu0 %v1830_v1  ;;  %v321_v62 = vld [vmem:[%s1967_s16 + $0x8] sm:$0xf]  ;;  %v324_v44 = vld [vmem:[%s1967_s16 + $0x14] sm:$0xf]  ;;  %s299_s12 = scalar_lea.vmem %s2160_s6, %s1669_s26 }
  0x13   : > { %313 = vperm.xlu0 %1783, %v306_v2   ;;  %vm1346_vm1 = vcmp.gt.s32.totalorder %v306_v2, 1  ;;  %1739 = vmatpush3.bf16.msra.mxu1 %v1795_v38  ;;  %v335_v50 = vld [vmem:[%s1967_s16 + $0x40] sm:$0xf]  ;;  %v336_v53 = vld [vmem:[%s1967_s16 + $0x44] sm:$0xf] }
  0x14   : > { %v1347_v23 = vsel %vm1346_vm1, %v306_v2, 1  ;;  %1740 = vmatprep.subr.bf16.mxu1 %v1830_v1  ;;  %v319_v56 = vld [vmem:[%s1967_s16] sm:$0xf]  ;;  %v320_v57 = vld [vmem:[%s1967_s16 + $0x4] sm:$0xf] }
  0x15   : > { %vm1348_vm2 = vcmp.lt.s32.totalorder %v1347_v23, 64  ;;  %1721 = vmatpush3.bf16.msra.mxu0 %v1788_v31  ;;  %v354_v31 = vld [vmem:[%s1967_s16 + $0x8c] sm:$0xf]  ;;  %v367_v40 = vld [vmem:[%s1967_s16 + $0xc0] sm:$0xf] }
  0x16   : > { %v1349_v25 = vsel %vm1348_vm2, %v1347_v23, 64  ;;  %1722 = vmatprep.subr.bf16.mxu0 %v1830_v1  ;;  %v368_v41 = vld [vmem:[%s1967_s16 + $0xc4] sm:$0xf] }
  0x17   : > { %v1350_v26 = vcvt.s32.f32 %v1349_v25  ;;  %1741 = vmatpush3.bf16.msra.mxu1 %v1796_v39  ;;  %v322_v25 = vld [vmem:[%s1967_s16 + $0xc] sm:$0xf] }
  0x18   : > { %1742 = vmatprep.subr.bf16.mxu1 %v1830_v1 }
  0x19   : > { %1801 = vrcp.f32 %v1350_v26  ;;  %1723 = vmatpush3.bf16.msra.mxu0 %v1789_v32 }
  0x1a   : > { %1724 = vmatprep.subr.bf16.mxu0 %v1830_v1 }
  0x1d   : > { %1725 = vmatpush3.bf16.msra.mxu0 %v1790_v33 }
  0x1e   : > { %1726 = vmatprep.subr.bf16.mxu0 %v1830_v1 }
  0x21   : > { %1727 = vmatpush3.bf16.msra.mxu0 %v1791_v34 }
  0x22   : > { %1728 = vmatprep.subr.bf16.mxu0 %v1830_v1 }
  0x23   : > { %v1802_v30 = vpop.eup %1801 }
  0x25   : > { %1729 = vmatpush3.bf16.msra.mxu0 %v1792_v35  ;;  %v323_v35 = vld [vmem:[%s1967_s16 + $0x10] sm:$0xf] }
  0x92   : > { %v314_v6 = vpop.permute.xlu0 %313 }
  0x93   : > { %vm315_vm0 = vcmp.lt.s32.totalorder %v309_v4, %v314_v6  ;;  %v337_v4 = vld [vmem:[%s1967_s16 + $0x48] sm:$0xf] }
  0x94   : > { %v1674_v7 = vsel %vm315_vm0, 1.0, %v1830_v1 }
  0x95   : > { %v318_v8 = vpack.c.bf16 %v1674_v7, %v1674_v7 }
  0x97   : > { %v384_v11 = vpack.i.b16 %v318_v8, %v318_v8  ;;  %v405_v18 = vshrl.u32 %v318_v8, 16 }
  0x99   : > { %v430_v12 = vrot.slane %v384_v11, %v429_v9  ;;  %v389_v13 = vrot.slane %v384_v11, %v388_v10  ;;  %v468_v15 = vrot.slane %v384_v11, %v467_v14  ;;  %v506_v17 = vrot.slane %v384_v11, %v505_v16 }
  0x9a   : > { %v406_v19 = vpack.i.b16 %v405_v18, %v405_v18 }
  0x9b   : > { %432 = vbcast.lane.c.b16.xlu1 %v430_v12, 256  ;;  %391 = vbcast.lane.c.b16.xlu0 %v389_v13, 256 }
  0x9c   : > { %v449_v20 = vrot.slane %v406_v19, %v429_v9  ;;  %v411_v21 = vrot.slane %v406_v19, %v388_v10  ;;  %v487_v22 = vrot.slane %v406_v19, %v467_v14  ;;  %v525_v24 = vrot.slane %v406_v19, %v505_v16  ;;  %v351_v9 = vld [vmem:[%s1967_s16 + $0x80] sm:$0xf]  ;;  %v352_v10 = vld [vmem:[%s1967_s16 + $0x84] sm:$0xf] }
  0x9f   : > { %436 = vbcast.lane.c.b16.xlu1 %v430_v12, 272  ;;  %395 = vbcast.lane.c.b16.xlu0 %v389_v13, 272 }
  0xa3   : > { %474 = vbcast.lane.c.b16.xlu1 %v468_v15, 272  ;;  %470 = vbcast.lane.c.b16.xlu0 %v468_v15, 256 }
  0xa7   : > { %399 = vbcast.lane.c.b16.xlu1 %v389_v13, 288  ;;  %508 = vbcast.lane.c.b16.xlu0 %v506_v17, 256 }
  0xab   : > { %440 = vbcast.lane.c.b16.xlu1 %v430_v12, 288  ;;  %512 = vbcast.lane.c.b16.xlu0 %v506_v17, 272 }
  0xaf   : > { %478 = vbcast.lane.c.b16.xlu1 %v468_v15, 288  ;;  %403 = vbcast.lane.c.b16.xlu0 %v389_v13, 304  ;;  %v338_v13 = vld [vmem:[%s1967_s16 + $0x4c] sm:$0xf] }
  0xb3   : > { %444 = vbcast.lane.c.b16.xlu1 %v430_v12, 304  ;;  %516 = vbcast.lane.c.b16.xlu0 %v506_v17, 288 }
  0xb7   : > { %482 = vbcast.lane.c.b16.xlu1 %v468_v15, 304  ;;  %451 = vbcast.lane.c.b16.xlu0 %v449_v20, 256 }
  0xbb   : > { %413 = vbcast.lane.c.b16.xlu1 %v411_v21, 256  ;;  %489 = vbcast.lane.c.b16.xlu0 %v487_v22, 256 }
  0xbf   : > { %417 = vbcast.lane.c.b16.xlu1 %v411_v21, 272  ;;  %421 = vbcast.lane.c.b16.xlu0 %v411_v21, 288 }
  0xc3   : > { %455 = vbcast.lane.c.b16.xlu1 %v449_v20, 272  ;;  %527 = vbcast.lane.c.b16.xlu0 %v525_v24, 256 }
  0xc7   : > { %493 = vbcast.lane.c.b16.xlu1 %v487_v22, 272  ;;  %531 = vbcast.lane.c.b16.xlu0 %v525_v24, 272 }
  0xcb   : > { %459 = vbcast.lane.c.b16.xlu1 %v449_v20, 288  ;;  %497 = vbcast.lane.c.b16.xlu0 %v487_v22, 288 }
  0xcf   : > { %425 = vbcast.lane.c.b16.xlu1 %v411_v21, 304  ;;  %535 = vbcast.lane.c.b16.xlu0 %v525_v24, 288 }
  0xd3   : > { %463 = vbcast.lane.c.b16.xlu1 %v449_v20, 304  ;;  %501 = vbcast.lane.c.b16.xlu0 %v487_v22, 304  ;;  %v353_v20 = vld [vmem:[%s1967_s16 + $0x88] sm:$0xf] }
  0xd7   : > { %520 = vbcast.lane.c.b16.xlu1 %v506_v17, 304  ;;  %539 = vbcast.lane.c.b16.xlu0 %v525_v24, 304 }
  0xdb   : > { %1355 = vperm.xlu1 %1784, %v1802_v30  }
 0x10d   : > { %v433_v48 = vpop.permute.xlu1 %432  ;;  %v392_v49 = vpop.permute.xlu0 %391 }
 0x10e   : > { %v691_v51 = vrot.slane %v433_v48, %v1959_v46  ;;  %v698_v52 = vrot.slane %v433_v48, %v1962_v47  ;;  %v579_v54 = vrot.slane %v392_v49, %v1959_v46  ;;  %v586_v55 = vrot.slane %v392_v49, %v1962_v47 }
 0x110   : > { %v1101_v58 = vmul.bf16 %v691_v51, %v335_v50  ;;  %v1102_v61 = vmul.bf16 %v698_v52, %v336_v53  ;;  %v1085_v63 = vmul.bf16 %v579_v54, %v319_v56  ;;  %v1086_v0 = vmul.bf16 %v586_v55, %v320_v57  ;;  %v339_v53 = vld [vmem:[%s1967_s16 + $0x50] sm:$0xf] }
 0x111   : > { %v437_v59 = vpop.permute.xlu1 %436  ;;  %v396_v60 = vpop.permute.xlu0 %395 }
 0x112   : > { %v705_v2 = vrot.slane %v437_v59, %v1959_v46  ;;  %v593_v3 = vrot.slane %v396_v60, %v1959_v46  ;;  %v1166_v5 = vunpack.c.l.bf16 %v1101_v58  ;;  %v712_v6 = vrot.slane %v437_v59, %v1962_v47 }
 0x113   : > { %v1167_v12 = vunpack.c.l.bf16 %v1102_v61  ;;  %v1150_v17 = vunpack.c.l.bf16 %v1085_v63  ;;  %v1151_v18 = vunpack.c.l.bf16 %v1086_v0  ;;  %v600_v21 = vrot.slane %v396_v60, %v1962_v47 }
 0x114   : > { %v1087_v7 = vmul.bf16 %v593_v3, %v321_v62  ;;  %v1103_v19 = vmul.bf16 %v705_v2, %v337_v4  ;;  %v1104_v24 = vmul.bf16 %v712_v6, %v338_v13  ;;  %v340_v62 = vld [vmem:[%s1967_s16 + $0x54] sm:$0xf]  ;;  %v369_v6 = vld [vmem:[%s1967_s16 + $0xc8] sm:$0xf] }
 0x115   : > { %v475_v8 = vpop.permute.xlu1 %474  ;;  %v471_v11 = vpop.permute.xlu0 %470  ;;  %v1240_v30 = vadd.f32 %v1167_v12, %v1166_v5  ;;  %v1214_v36 = vadd.f32 %v1151_v18, %v1150_v17  ;;  %v1088_v42 = vmul.bf16 %v600_v21, %v322_v25  ;;  %v370_v17 = vld [vmem:[%s1967_s16 + $0xcc] sm:$0xf]  ;;  %v356_v25 = vld [vmem:[%s1967_s16 + $0x94] sm:$0xf] }
 0x116   : > { %v817_v14 = vrot.slane %v475_v8, %v1959_v46  ;;  %v803_v15 = vrot.slane %v471_v11, %v1959_v46  ;;  %v810_v16 = vrot.slane %v471_v11, %v1962_v47  ;;  %v1152_v26 = vunpack.c.l.bf16 %v1087_v7  ;;  %v355_v11 = vld [vmem:[%s1967_s16 + $0x90] sm:$0xf] }
 0x117   : > { %v824_v27 = vrot.slane %v475_v8, %v1962_v47  ;;  %v1168_v37 = vunpack.c.l.bf16 %v1103_v19  ;;  %v1169_v49 = vunpack.c.l.bf16 %v1104_v24  ;;  %v1153_v2 = vunpack.c.l.bf16 %v1088_v42 }
 0x118   : > { %v1117_v22 = vmul.bf16 %v803_v15, %v351_v9  ;;  %v1118_v23 = vmul.bf16 %v810_v16, %v352_v10  ;;  %v1119_v32 = vmul.bf16 %v817_v14, %v353_v20  ;;  %v1215_v50 = vadd.f32 %v1214_v36, %v1152_v26 }
 0x119   : > { %v400_v28 = vpop.permute.xlu1 %399  ;;  %v509_v29 = vpop.permute.xlu0 %508  ;;  %v1120_v51 = vmul.bf16 %v824_v27, %v354_v31  ;;  %v1241_v60 = vadd.f32 %v1240_v30, %v1168_v37 }
 0x11a   : > { %v1182_v33 = vunpack.c.l.bf16 %v1117_v22  ;;  %v1183_v34 = vunpack.c.l.bf16 %v1118_v23  ;;  %v607_v38 = vrot.slane %v400_v28, %v1959_v46  ;;  %v614_v39 = vrot.slane %v400_v28, %v1962_v47  ;;  %v325_v23 = vld [vmem:[%s1967_s16 + $0x18] sm:$0xf]  ;;  %v326_v28 = vld [vmem:[%s1967_s16 + $0x1c] sm:$0xf] }
 0x11b   : > { %v915_v45 = vrot.slane %v509_v29, %v1959_v46  ;;  %v922_v48 = vrot.slane %v509_v29, %v1962_v47  ;;  %v1184_v56 = vunpack.c.l.bf16 %v1119_v32  ;;  %v1185_v7 = vunpack.c.l.bf16 %v1120_v51 }
 0x11c   : > { %v1266_v43 = vadd.f32 %v1183_v34, %v1182_v33  ;;  %v1089_v52 = vmul.bf16 %v607_v38, %v323_v35  ;;  %v1090_v61 = vmul.bf16 %v614_v39, %v324_v44  ;;  %v1216_v14 = vadd.f32 %v1215_v50, %v1153_v2  ;;  %v341_v34 = vld [vmem:[%s1967_s16 + $0x58] sm:$0xf]  ;;  %v358_v2 = vld [vmem:[%s1967_s16 + $0x9c] sm:$0xf] }
 0x11d   : > { %v441_v54 = vpop.permute.xlu1 %440  ;;  %v513_v55 = vpop.permute.xlu0 %512  ;;  %v1133_v57 = vmul.bf16 %v915_v45, %v367_v40  ;;  %v1134_v58 = vmul.bf16 %v922_v48, %v368_v41  ;;  %v1242_v19 = vadd.f32 %v1241_v60, %v1169_v49  ;;  %v342_v40 = vld [vmem:[%s1967_s16 + $0x5c] sm:$0xf]  ;;  %v371_v48 = vld [vmem:[%s1967_s16 + $0xd0] sm:$0xf] }
 0x11e   : > { %v719_v59 = vrot.slane %v441_v54, %v1959_v46  ;;  %v726_v63 = vrot.slane %v441_v54, %v1962_v47  ;;  %v929_v0 = vrot.slane %v513_v55, %v1959_v46  ;;  %v1267_v3 = vadd.f32 %v1266_v43, %v1184_v56  ;;  %v372_v56 = vld [vmem:[%s1967_s16 + $0xd4] sm:$0xf] }
 0x11f   : > { %v1154_v4 = vunpack.c.l.bf16 %v1089_v52  ;;  %v1198_v8 = vunpack.c.l.bf16 %v1133_v57  ;;  %v1199_v9 = vunpack.c.l.bf16 %v1134_v58  ;;  %v936_v10 = vrot.slane %v513_v55, %v1962_v47 }
 0x120   : > { %v1105_v5 = vmul.bf16 %v719_v59, %v339_v53  ;;  %v1106_v15 = vmul.bf16 %v726_v63, %v340_v62  ;;  %v1155_v20 = vunpack.c.l.bf16 %v1090_v61  ;;  %v1135_v21 = vmul.bf16 %v929_v0, %v369_v6  ;;  %v357_v0 = vld [vmem:[%s1967_s16 + $0x98] sm:$0xf] }
 0x121   : > { %v479_v12 = vpop.permute.xlu1 %478  ;;  %v404_v13 = vpop.permute.xlu0 %403  ;;  %v1217_v24 = vadd.f32 %v1216_v14, %v1154_v4  ;;  %v1268_v27 = vadd.f32 %v1267_v3, %v1185_v7  ;;  %v1292_v30 = vadd.f32 %v1199_v9, %v1198_v8  ;;  %v1136_v32 = vmul.bf16 %v936_v10, %v370_v17  ;;  %v343_v10 = vld [vmem:[%s1967_s16 + $0x60] sm:$0xf] }
 0x122   : > { %v1170_v16 = vunpack.c.l.bf16 %v1105_v5  ;;  %v831_v18 = vrot.slane %v479_v12, %v1959_v46  ;;  %v838_v22 = vrot.slane %v479_v12, %v1962_v47  ;;  %v621_v29 = vrot.slane %v404_v13, %v1959_v46 }
 0x123   : > { %v628_v33 = vrot.slane %v404_v13, %v1962_v47  ;;  %v1171_v37 = vunpack.c.l.bf16 %v1106_v15  ;;  %v1200_v42 = vunpack.c.l.bf16 %v1135_v21  ;;  %v1218_v49 = vadd.f32 %v1217_v24, %v1155_v20  ;;  %v344_v15 = vld [vmem:[%s1967_s16 + $0x64] sm:$0xf] }
 0x124   : > { %v1121_v26 = vmul.bf16 %v831_v18, %v355_v11  ;;  %v1243_v31 = vadd.f32 %v1242_v19, %v1170_v16  ;;  %v1091_v39 = vmul.bf16 %v621_v29, %v325_v23  ;;  %v1122_v43 = vmul.bf16 %v838_v22, %v356_v25  ;;  %v327_v23 = vld [vmem:[%s1967_s16 + $0x20] sm:$0xf] }
 0x125   : > { %v445_v35 = vpop.permute.xlu1 %444  ;;  %v517_v36 = vpop.permute.xlu0 %516  ;;  %v1092_v44 = vmul.bf16 %v628_v33, %v326_v28  ;;  %v1293_v3 = vadd.f32 %v1292_v30, %v1200_v42  ;;  %v1201_v19 = vunpack.c.l.bf16 %v1136_v32 }
 0x126   : > { %v1186_v38 = vunpack.c.l.bf16 %v1121_v26  ;;  %v733_v41 = vrot.slane %v445_v35, %v1959_v46  ;;  %v740_v45 = vrot.slane %v445_v35, %v1962_v47  ;;  %v1156_v50 = vunpack.c.l.bf16 %v1091_v39 }
 0x127   : > { %v943_v52 = vrot.slane %v517_v36, %v1959_v46  ;;  %v1244_v53 = vadd.f32 %v1243_v31, %v1171_v37  ;;  %v950_v57 = vrot.slane %v517_v36, %v1962_v47  ;;  %v1157_v60 = vunpack.c.l.bf16 %v1092_v44  ;;  %v328_v31 = vld [vmem:[%s1967_s16 + $0x24] sm:$0xf]  ;;  %v359_v36 = vld [vmem:[%s1967_s16 + $0xa0] sm:$0xf] }
 0x128   : > { %v1107_v51 = vmul.bf16 %v733_v41, %v341_v34  ;;  %v1269_v54 = vadd.f32 %v1268_v27, %v1186_v38  ;;  %v1108_v55 = vmul.bf16 %v740_v45, %v342_v40  ;;  %v1219_v61 = vadd.f32 %v1218_v49, %v1156_v50  ;;  %v360_v37 = vld [vmem:[%s1967_s16 + $0xa4] sm:$0xf] }
 0x129   : > { %v483_v58 = vpop.permute.xlu1 %482  ;;  %v452_v59 = vpop.permute.xlu0 %451  ;;  %v1137_v63 = vmul.bf16 %v943_v52, %v371_v48  ;;  %v1187_v4 = vunpack.c.l.bf16 %v1122_v43  ;;  %v1138_v9 = vmul.bf16 %v950_v57, %v372_v56  ;;  %v1294_v28 = vadd.f32 %v1293_v3, %v1201_v19 }
 0x12a   : > { %v1172_v62 = vunpack.c.l.bf16 %v1107_v51  ;;  %v845_v5 = vrot.slane %v483_v58, %v1959_v46  ;;  %v852_v6 = vrot.slane %v483_v58, %v1962_v47  ;;  %v1220_v7 = vadd.f32 %v1219_v61, %v1157_v60 }
 0x12b   : > { %v747_v11 = vrot.slane %v452_v59, %v1959_v46  ;;  %v1173_v12 = vunpack.c.l.bf16 %v1108_v55  ;;  %v754_v16 = vrot.slane %v452_v59, %v1962_v47  ;;  %v1270_v20 = vadd.f32 %v1269_v54, %v1187_v4  ;;  %v329_v54 = vld [vmem:[%s1967_s16 + $0x28] sm:$0xf]  ;;  %v330_v55 = vld [vmem:[%s1967_s16 + $0x2c] sm:$0xf]  ;;  %v331_v4 = vld [vmem:[%s1967_s16 + $0x30] sm:$0xf] }
 0x12c   : > { %v1245_v8 = vadd.f32 %v1244_v53, %v1172_v62  ;;  %v1123_v13 = vmul.bf16 %v845_v5, %v357_v0  ;;  %v1124_v14 = vmul.bf16 %v852_v6, %v358_v2  ;;  %v1221_v21 = vrot.slane %v1220_v7, 4 }
 0x12d   : > { %v414_v17 = vpop.permute.xlu1 %413  ;;  %v490_v18 = vpop.permute.xlu0 %489  ;;  %v1202_v22 = vunpack.c.l.bf16 %v1137_v63  ;;  %v1109_v26 = vmul.bf16 %v747_v11, %v343_v10  ;;  %v1203_v29 = vunpack.c.l.bf16 %v1138_v9  ;;  %v1110_v30 = vmul.bf16 %v754_v16, %v344_v15  ;;  %v346_v15 = vld [vmem:[%s1967_s16 + $0x6c] sm:$0xf] }
 0x12e   : > { %v1246_v24 = vadd.f32 %v1245_v8, %v1173_v12  ;;  %v1188_v25 = vunpack.c.l.bf16 %v1123_v13  ;;  %v635_v27 = vrot.slane %v414_v17, %v1959_v46  ;;  %v1189_v33 = vunpack.c.l.bf16 %v1124_v14  ;;  %v332_v8 = vld [vmem:[%s1967_s16 + $0x34] sm:$0xf]  ;;  %v345_v14 = vld [vmem:[%s1967_s16 + $0x68] sm:$0xf] }
 0x12f   : > { %v642_v35 = vrot.slane %v414_v17, %v1962_v47  ;;  %v1222_v40 = vadd.f32 %v1221_v21, %v1220_v7  ;;  %v1295_v41 = vadd.f32 %v1294_v28, %v1202_v22  ;;  %v859_v42 = vrot.slane %v490_v18, %v1959_v46  ;;  %v375_v22 = vld [vmem:[%s1967_s16 + $0xe0] sm:$0xf] }
 0x130   : > { %v1271_v34 = vadd.f32 %v1270_v20, %v1188_v25  ;;  %v1093_v32 = vmul.bf16 %v635_v27, %v327_v23  ;;  %v866_v43 = vrot.slane %v490_v18, %v1962_v47  ;;  %v1247_v44 = vrot.slane %v1246_v24, 4 }
 0x131   : > { %v418_v38 = vpop.permute.xlu1 %417  ;;  %v422_v39 = vpop.permute.xlu0 %421  ;;  %v1174_v48 = vunpack.c.l.bf16 %v1109_v26  ;;  %v1094_v49 = vmul.bf16 %v642_v35, %v328_v31  ;;  %v1175_v50 = vunpack.c.l.bf16 %v1110_v30  ;;  %v1125_v52 = vmul.bf16 %v859_v42, %v359_v36  ;;  %v376_v26 = vld [vmem:[%s1967_s16 + $0xe4] sm:$0xf]  ;;  %v361_v36 = vld [vmem:[%s1967_s16 + $0xa8] sm:$0xf]  ;;  %v362_v42 = vld [vmem:[%s1967_s16 + $0xac] sm:$0xf] }
 0x132   : > { %v1272_v45 = vadd.f32 %v1271_v34, %v1189_v33  ;;  %v1158_v51 = vunpack.c.l.bf16 %v1093_v32  ;;  %v1126_v53 = vmul.bf16 %v866_v43, %v360_v37  ;;  %v649_v58 = vrot.slane %v418_v38, %v1959_v46 }
 0x133   : > { %v1159_v57 = vunpack.c.l.bf16 %v1094_v49  ;;  %v656_v59 = vrot.slane %v418_v38, %v1962_v47  ;;  %v1223_v62 = vrot.slane %v1222_v40, 2  ;;  %v2045_v63 = vadd.f32 %v1247_v44, %v1246_v24 }
 0x134   : > { %v1273_v56 = vrot.slane %v1272_v45, 4  ;;  %v2047_v0 = vadd.f32 %v1295_v41, %v1203_v29  ;;  %v1095_v2 = vmul.bf16 %v649_v58, %v329_v54  ;;  %v1253_v5 = vadd.f32 %v1175_v50, %v1174_v48  ;;  %v377_v50 = vld [vmem:[%s1967_s16 + $0xe8] sm:$0xf]  ;;  %v378_v54 = vld [vmem:[%s1967_s16 + $0xec] sm:$0xf] }
 0x135   : > { %v456_v60 = vpop.permute.xlu1 %455  ;;  %v528_v61 = vpop.permute.xlu0 %527  ;;  %v1096_v3 = vmul.bf16 %v656_v59, %v330_v55  ;;  %v1190_v6 = vunpack.c.l.bf16 %v1125_v52  ;;  %v1191_v7 = vunpack.c.l.bf16 %v1126_v53  ;;  %v663_v9 = vrot.slane %v422_v39, %v1959_v46 }
 0x136   : > { %v2052_v10 = vadd.f32 %v1273_v56, %v1272_v45  ;;  %v1227_v11 = vadd.f32 %v1159_v57, %v1158_v51  ;;  %v1160_v12 = vunpack.c.l.bf16 %v1095_v2  ;;  %v670_v13 = vrot.slane %v422_v39, %v1962_v47  ;;  %v347_v56 = vld [vmem:[%s1967_s16 + $0x70] sm:$0xf] }
 0x137   : > { %v2057_v18 = vadd.f32 %v1223_v62, %v1222_v40  ;;  %v1097_v19 = vmul.bf16 %v663_v9, %v331_v4  ;;  %v761_v20 = vrot.slane %v456_v60, %v1959_v46  ;;  %v768_v21 = vrot.slane %v456_v60, %v1962_v47 }
 0x138   : > { %v1161_v23 = vunpack.c.l.bf16 %v1096_v3  ;;  %v1228_v24 = vadd.f32 %v1227_v11, %v1160_v12  ;;  %v2062_v25 = vmul.bf16 %v670_v13, %v332_v8  ;;  %v971_v27 = vrot.slane %v528_v61, %v1959_v46  ;;  %v363_v12 = vld [vmem:[%s1967_s16 + $0xb0] sm:$0xf]  ;;  %v364_v13 = vld [vmem:[%s1967_s16 + $0xb4] sm:$0xf] }
 0x139   : > { %v494_v16 = vpop.permute.xlu1 %493  ;;  %v532_v17 = vpop.permute.xlu0 %531  ;;  %v1249_v28 = vrot.slane %v2045_v63, 2  ;;  %v1111_v29 = vmul.bf16 %v761_v20, %v345_v14  ;;  %v1112_v30 = vmul.bf16 %v768_v21, %v346_v15  ;;  %v978_v31 = vrot.slane %v528_v61, %v1962_v47 }
 0x13a   : > { %v1275_v33 = vrot.slane %v2052_v10, 2  ;;  %v1279_v34 = vadd.f32 %v1191_v7, %v1190_v6  ;;  %v1229_v35 = vadd.f32 %v1228_v24, %v1161_v23  ;;  %v1141_v32 = vmul.bf16 %v971_v27, %v375_v22  ;;  %v348_v6 = vld [vmem:[%s1967_s16 + $0x74] sm:$0xf] }
 0x13b   : > { %v1162_v39 = vunpack.c.l.bf16 %v1097_v19  ;;  %v1176_v40 = vunpack.c.l.bf16 %v1111_v29  ;;  %v1142_v41 = vmul.bf16 %v978_v31, %v376_v26  ;;  %v873_v43 = vrot.slane %v494_v16, %v1959_v46  ;;  %v333_v19 = vld [vmem:[%s1967_s16 + $0x38] sm:$0xf] }
 0x13c   : > { %v1163_v44 = vunpack.c.l.bf16 %v2062_v25  ;;  %v1177_v45 = vunpack.c.l.bf16 %v1112_v30  ;;  %v1206_v48 = vunpack.c.l.bf16 %v1141_v32  ;;  %v880_v49 = vrot.slane %v494_v16, %v1962_v47  ;;  %v334_v30 = vld [vmem:[%s1967_s16 + $0x3c] sm:$0xf] }
 0x13d   : > { %v460_v37 = vpop.permute.xlu1 %459  ;;  %v498_v38 = vpop.permute.xlu0 %497  ;;  %v1254_v51 = vadd.f32 %v1253_v5, %v1176_v40  ;;  %v1207_v52 = vunpack.c.l.bf16 %v1142_v41  ;;  %v1127_v53 = vmul.bf16 %v873_v43, %v361_v36  ;;  %v985_v55 = vrot.slane %v532_v17, %v1959_v46  ;;  %v379_v36 = vld [vmem:[%s1967_s16 + $0xf0] sm:$0xf]  ;;  %v380_v41 = vld [vmem:[%s1967_s16 + $0xf4] sm:$0xf] }
 0x13e   : > { %v1230_v57 = vadd.f32 %v1229_v35, %v1162_v39  ;;  %v1128_v58 = vmul.bf16 %v880_v49, %v362_v42  ;;  %v992_v59 = vrot.slane %v532_v17, %v1962_v47  ;;  %v775_v60 = vrot.slane %v460_v37, %v1959_v46 }
 0x13f   : > { %v1255_v2 = vadd.f32 %v1254_v51, %v1177_v45  ;;  %v1305_v3 = vadd.f32 %v1207_v52, %v1206_v48  ;;  %v1192_v4 = vunpack.c.l.bf16 %v1127_v53  ;;  %v1143_v5 = vmul.bf16 %v985_v55, %v377_v50  ;;  %v350_v50 = vld [vmem:[%s1967_s16 + $0x7c] sm:$0xf]  ;;  %v365_v55 = vld [vmem:[%s1967_s16 + $0xb8] sm:$0xf] }
 0x140   : > { %v1193_v7 = vunpack.c.l.bf16 %v1128_v58  ;;  %v1144_v8 = vmul.bf16 %v992_v59, %v378_v54  ;;  %v782_v9 = vrot.slane %v460_v37, %v1962_v47  ;;  %v1113_v11 = vmul.bf16 %v775_v60, %v347_v56 }
 0x141   : > { %v426_v61 = vpop.permute.xlu1 %425  ;;  %v536_v62 = vpop.permute.xlu0 %535  ;;  %v1280_v14 = vadd.f32 %v1279_v34, %v1192_v4  ;;  %v1208_v15 = vunpack.c.l.bf16 %v1143_v5  ;;  %v887_v16 = vrot.slane %v498_v38, %v1959_v46  ;;  %v894_v17 = vrot.slane %v498_v38, %v1962_v47  ;;  %v366_v4 = vld [vmem:[%s1967_s16 + $0xbc] sm:$0xf] }
 0x142   : > { %v1209_v20 = vunpack.c.l.bf16 %v1144_v8  ;;  %v1114_v21 = vmul.bf16 %v782_v9, %v348_v6  ;;  %v1178_v22 = vunpack.c.l.bf16 %v1113_v11  ;;  %v677_v23 = vrot.slane %v426_v61, %v1959_v46  ;;  %v373_v9 = vld [vmem:[%s1967_s16 + $0xd8] sm:$0xf] }
 0x143   : > { %v1281_v25 = vadd.f32 %v1280_v14, %v1193_v7  ;;  %v1306_v26 = vadd.f32 %v1305_v3, %v1208_v15  ;;  %v1129_v27 = vmul.bf16 %v887_v16, %v363_v12  ;;  %v1130_v29 = vmul.bf16 %v894_v17, %v364_v13  ;;  %v374_v15 = vld [vmem:[%s1967_s16 + $0xdc] sm:$0xf] }
 0x144   : > { %v1231_v31 = vadd.f32 %v1230_v57, %v1163_v44  ;;  %v1179_v34 = vunpack.c.l.bf16 %v1114_v21  ;;  %v684_v35 = vrot.slane %v426_v61, %v1962_v47  ;;  %v1099_v32 = vmul.bf16 %v677_v23, %v333_v19  ;;  %v349_v44 = vld [vmem:[%s1967_s16 + $0x78] sm:$0xf] }
 0x145   : > { %v464_v24 = vpop.permute.xlu1 %463  ;;  %v502_v37 = vpop.permute.xlu0 %501  ;;  %v1307_v38 = vadd.f32 %v1306_v26, %v1209_v20  ;;  %v1256_v39 = vadd.f32 %v1255_v2, %v1178_v22  ;;  %v1194_v40 = vunpack.c.l.bf16 %v1129_v27  ;;  %v999_v42 = vrot.slane %v536_v62, %v1959_v46  ;;  %v381_v22 = vld [vmem:[%s1967_s16 + $0xf8] sm:$0xf] }
 0x146   : > { %v1195_v43 = vunpack.c.l.bf16 %v1130_v29  ;;  %v1100_v45 = vmul.bf16 %v684_v35, %v334_v30  ;;  %v1164_v48 = vunpack.c.l.bf16 %v1099_v32  ;;  %v1006_v49 = vrot.slane %v536_v62, %v1962_v47 }
 0x147   : > { %v1282_v51 = vadd.f32 %v1281_v25, %v1194_v40  ;;  %v1145_v52 = vmul.bf16 %v999_v42, %v379_v36  ;;  %v789_v53 = vrot.slane %v464_v24, %v1959_v46  ;;  %v796_v54 = vrot.slane %v464_v24, %v1962_v47 }
 0x148   : > { %v1165_v56 = vunpack.c.l.bf16 %v1100_v45  ;;  %v1232_v57 = vadd.f32 %v1231_v31, %v1164_v48  ;;  %v1146_v58 = vmul.bf16 %v1006_v49, %v380_v41  ;;  %v901_v59 = vrot.slane %v502_v37, %v1959_v46 }
 0x149   : > { %v521_v60 = vpop.permute.xlu1 %520  ;;  %v1257_v61 = vadd.f32 %v1256_v39, %v1179_v34  ;;  %v1210_v62 = vunpack.c.l.bf16 %v1145_v52  ;;  %v1115_v2 = vmul.bf16 %v789_v53, %v349_v44  ;;  %v1116_v3 = vmul.bf16 %v796_v54, %v350_v50  ;;  %v540_v11 = vpop.permute.xlu0 %539  ;;  %v382_v34 = vld [vmem:[%s1967_s16 + $0xfc] sm:$0xf] }
 0x14a   : > { %v1283_v5 = vadd.f32 %v1282_v51, %v1195_v43  ;;  %v1233_v6 = vadd.f32 %v1232_v57, %v1165_v56  ;;  %v908_v7 = vrot.slane %v502_v37, %v1962_v47  ;;  %v1131_v8 = vmul.bf16 %v901_v59, %v365_v55 }
 0x14b   : > { %v1211_v12 = vunpack.c.l.bf16 %v1146_v58  ;;  %v1308_v13 = vadd.f32 %v1307_v38, %v1210_v62  ;;  %v1180_v14 = vunpack.c.l.bf16 %v1115_v2  ;;  %v957_v16 = vrot.slane %v521_v60, %v1959_v46 }
 0x14c   : > { %v1234_v17 = vrot.slane %v1233_v6, 4  ;;  %v1132_v19 = vmul.bf16 %v908_v7, %v366_v4  ;;  %v1196_v20 = vunpack.c.l.bf16 %v1131_v8  ;;  %v964_v21 = vrot.slane %v521_v60, %v1962_v47 }
 0x14d   : > { %v1181_v23 = vunpack.c.l.bf16 %v1116_v3  ;;  %v1258_v24 = vadd.f32 %v1257_v61, %v1180_v14  ;;  %v1139_v25 = vmul.bf16 %v957_v16, %v373_v9  ;;  %v1013_v26 = vrot.slane %v540_v11, %v1959_v46 }
 0x14e   : > { %v1235_v27 = vadd.f32 %v1234_v17, %v1233_v6  ;;  %v1197_v29 = vunpack.c.l.bf16 %v1132_v19  ;;  %v1284_v30 = vadd.f32 %v1283_v5, %v1196_v20  ;;  %v1140_v31 = vmul.bf16 %v964_v21, %v374_v15 }
 0x14f   : > { %v1259_v35 = vadd.f32 %v1258_v24, %v1181_v23  ;;  %v1204_v32 = vunpack.c.l.bf16 %v1139_v25  ;;  %v1020_v36 = vrot.slane %v540_v11, %v1962_v47  ;;  %v1147_v37 = vmul.bf16 %v1013_v26, %v381_v22 }
 0x150   : > { %v1236_v38 = vrot.slane %v1235_v27, 2  ;;  %v1309_v39 = vadd.f32 %v1308_v13, %v1211_v12  ;;  %v1285_v40 = vadd.f32 %v1284_v30, %v1197_v29  ;;  %v1205_v41 = vunpack.c.l.bf16 %v1140_v31  ;;  %v1797_v30 = vld [vmem:[%s2158_s4 + $0x20] sm:$0xff]   ;;  %v1798_v31 = vld [vmem:[%s2158_s4 + $0x28] sm:$0xff]  }
 0x151   : > { %v1260_v42 = vrot.slane %v1259_v35, 4  ;;  %v1297_v43 = vadd.f32 %v2047_v0, %v1204_v32  ;;  %v1148_v45 = vmul.bf16 %v1020_v36, %v382_v34  ;;  %v1212_v48 = vunpack.c.l.bf16 %v1147_v37  ;;  %1743 = vmatpush3.bf16.msra.mxu1 %v1797_v30  ;;  %v1799_v34 = vld [vmem:[%s2158_s4 + $0x30] sm:$0xff]   ;;  %v1675_v32 = vld [vmem:[%s2157_s3] ss:$0 sm:$0xff] }
 0x152   : > { %v1225_v46 = vrot.slane %v2057_v18, 1  ;;  %v1250_v49 = vadd.f32 %v1249_v28, %v2045_v63  ;;  %v1237_v44 = vadd.f32 %v1236_v38, %v1235_v27  ;;  %v1286_v50 = vrot.slane %v1285_v40, 4  ;;  %1744 = vmatprep.subr.bf16.mxu1 %v1830_v1 }
 0x153   : > { %v1261_v51 = vadd.f32 %v1260_v42, %v1259_v35  ;;  %v1298_v47 = vadd.f32 %v1297_v43, %v1205_v41  ;;  %v1213_v52 = vunpack.c.l.bf16 %v1148_v45  ;;  %v1310_v53 = vadd.f32 %v1309_v39, %v1212_v48  ;;  %v1800_v35 = vld [vmem:[%s2158_s4 + $0x38] sm:$0xff]  }
 0x154   : > { %v1276_v54 = vadd.f32 %v1275_v33, %v2052_v10  ;;  %v1238_v55 = vrot.slane %v1237_v44, 1  ;;  %v1287_v0 = vadd.f32 %v1286_v50, %v1285_v40  ;;  %v1251_v59 = vrot.slane %v1250_v49, 1 }
 0x155   : > { %v1262_v56 = vrot.slane %v1261_v51, 2  ;;  %v1299_v57 = vrot.slane %v1298_v47, 4  ;;  %v1311_v58 = vadd.f32 %v1310_v53, %v1213_v52  ;;  %v1226_v63 = vadd.f32 %v1225_v46, %v2057_v18  ;;  %1745 = vmatpush3.bf16.msra.mxu1 %v1798_v31 }
 0x156   : > { %v1239_v60 = vadd.f32 %v1238_v55, %v1237_v44  ;;  %v1288_v61 = vrot.slane %v1287_v0, 2  ;;  %v1277_v3 = vrot.slane %v1276_v54, 1  ;;  %v1252_v7 = vadd.f32 %v1251_v59, %v1250_v49  ;;  %1746 = vmatprep.subr.bf16.mxu1 %v1830_v1 }
 0x157   : > { %v1263_v28 = vadd.f32 %v1262_v56, %v1261_v51  ;;  %v1300_v62 = vadd.f32 %v1299_v57, %v1298_v47  ;;  %v1312_v2 = vrot.slane %v1311_v58, 4 }
 0x158   : > { %v1289_v4 = vadd.f32 %v1288_v61, %v1287_v0  ;;  %v1327_v33 = vsel %vm1326_vm4, %v1239_v60, %v1226_v63  ;;  %v1278_v13 = vadd.f32 %v1277_v3, %v1276_v54 }
 0x159   : > { %v1264_v5 = vrot.slane %v1263_v28, 1  ;;  %v1301_v6 = vrot.slane %v1300_v62, 2  ;;  %v1313_v10 = vadd.f32 %v1312_v2, %v1311_v58  ;;  %v1329_v14 = vsel %vm1328_vm5, %v1252_v7, %v1327_v33  ;;  %1747 = vmatpush3.bf16.msra.mxu1 %v1799_v34 }
 0x15a   : > { %v1290_v8 = vrot.slane %v1289_v4, 1  ;;  %v1356_v25 = vpop.permute.xlu1 %1355  ;;  %1748 = vmatprep.subr.bf16.mxu1 %v1830_v1  ;;  %v1684_v1 = vld [vmem:[%s2159_s5] ss:$0 sm:$0xff] }
 0x15b   : > { %v1265_v9 = vadd.f32 %v1264_v5, %v1263_v28  ;;  %v1314_v11 = vrot.slane %v1313_v10, 2  ;;  %v1302_v12 = vadd.f32 %v1301_v6, %v1300_v62 }
 0x15c   : > { %v1291_v18 = vadd.f32 %v1290_v8, %v1289_v4 }
 0x15d   : > { %v1303_v15 = vrot.slane %v1302_v12, 1  ;;  %v1315_v16 = vadd.f32 %v1314_v11, %v1313_v10  ;;  %v1331_v17 = vsel %vm1330_vm6, %v1265_v9, %v1329_v14  ;;  %1749 = vmatpush3.bf16.msra.mxu1 %v1800_v35 }
 0x15e   : > { %v1333_v19 = vsel %vm1332_vm7, %v1278_v13, %v1331_v17 }
 0x15f   : > { %v1304_v20 = vadd.f32 %v1303_v15, %v1302_v12  ;;  %v1316_v21 = vrot.slane %v1315_v16, 1  ;;  %v1335_v22 = vsel %vm1334_vm8, %v1291_v18, %v1333_v19 }
 0x161   : > { %v1317_v23 = vadd.f32 %v1316_v21, %v1315_v16  ;;  %v1337_v24 = vsel %vm1336_vm9, %v1304_v20, %v1335_v22 }
 0x163   : > { %v1339_v26 = vsel %vm1338_vm10, %v1317_v23, %v1337_v24 }
 0x164   : > { %v1358_v27 = vmul.f32 %v1356_v25, %v1339_v26 }
 0x166   : > { %v1359_v29 = vpack.c.bf16 %v1358_v27, %v1358_v27 }
 0x168   : > { %1731 = vmatmul.mubr.bf16.vlgmr.msra.gmra.mrb[0].mxu0 %v1359_v29 }
 0x23b   : > { %v1465_v36 = vpop.f32.mrb[0].mxu0 }
 0x23c   : > { %v1466_v37 = vadd.f32 %v1675_v32, %v1465_v36  ;;  %v1732_v38 = vpop.f32.mrb[1].mxu0 }
 0x23d   : > { %v1468_v39 = vpop.f32.mrb[2].mxu0 }
 0x23e   : > { %1803 = vtanh.f32 %v1466_v37  ;;  %v1733_v40 = vpop.f32.mrb[3].mxu0 }
 0x248   : > { %v1804_v41 = vpop.eup %1803 }
 0x249   : > { %v1472_v42 = vpack.c.bf16 %v1804_v41, %v1804_v41 }
 0x24b   : > { %1751 = vmatmul.mubr.bf16.vlgmr.msra.gmra.mrb[0].mxu1 %v1472_v42 }
 0x31e   : > { %v1578_v43 = vpop.f32.mrb[0].mxu1 }
 0x31f   : > { %v1579_v45 = vadd.f32 %v1684_v1, %v1578_v43  ;;  %v1752_v48 = vpop.f32.mrb[1].mxu1 }
 0x320   : > { %v1581_v46 = vpop.f32.mrb[2].mxu1 }
 0x321   : > { %1584 = vst [vmem:[%s299_s12] sm:$0xff] %v1579_v45  ;;  %v1753_v49 = vpop.f32.mrb[3].mxu1 }
 0x322 PF: > { %s16_s23 = sadd.s32 1, %s1827_s23   ;;  %s2161_s21 = smov %s1823_s22 }
 0x323   : > { %p13_p6 = scmp.ge.s32.totalorder %s16_s23, 4   ;;  %s2162_s22 = smov %s2164_s24 }
 0x325   :  { %15 = sbr.rel (!%p13_p6) target bundleno = 2 (0x2), region = 85 }

</bundles_post_ra>
